<compile_context>
chip_gen: v5e
topology: v5e:2x2
jax: 0.10.0
libtpu: 0.0.40
codegen_flags: <defaults>
</compile_context>

<pallas_src>
import jax
import jax.numpy as jnp
from jax.experimental import pallas as pl
from jax.experimental.pallas import tpu as pltpu


def _round_up(n: int, m: int) -> int:
    return ((n + m - 1) // m) * m


def _choose_batch_tile(B: int, batch_tile: int) -> int:
    """Pick the batch tile.  Large batches stream batch_tile-sized tiles
    (>=2 grid steps guaranteed); mid-size batches are split in two so the
    'parallel' axis spans both v7x TensorCores; tiny batches use one tile."""
    assert batch_tile % 8 == 0
    Bp8 = _round_up(B, 8)
    if Bp8 > batch_tile:
        return batch_tile
    if Bp8 >= 16 and Bp8 % 16 == 0:
        return Bp8 // 2
    return Bp8


def actor_sac_kernel(x_ref, w1_ref, b1_ref, w2_ref, b2_ref, w3_ref, b3_ref,
                     probs_ref):
    """One batch tile of (Linear+ReLU) x2 -> Linear -> softmax.

    Weights are bf16 (MXU operands); all accumulation and the epilogue
    (bias, ReLU, softmax) are f32.
    """
    # Layer 1: Linear + ReLU   (K = state_dim, unpadded)
    x = x_ref[...].astype(w1_ref.dtype)
    h1 = jnp.dot(x, w1_ref[...], preferred_element_type=jnp.float32)
    h1 = jnp.maximum(h1 + b1_ref[...], 0.0)          # b1 [1,H1p] broadcasts

    # Layer 2: Linear + ReLU
    h2 = jnp.dot(h1.astype(w2_ref.dtype), w2_ref[...],
                 preferred_element_type=jnp.float32)
    h2 = jnp.maximum(h2 + b2_ref[...], 0.0)

    # Output layer -> logits (true action_dim lanes, no padding/mask needed)
    logits = jnp.dot(h2.astype(w3_ref.dtype), w3_ref[...],
                     preferred_element_type=jnp.float32)
    logits = logits + b3_ref[...]

    # Numerically stable softmax.  Exact divide: downstream SAC code computes
    # entropy / log-probs from these probabilities.
    m = jnp.max(logits, axis=-1, keepdims=True)
    e = jnp.exp(logits - m)
    denom = jnp.sum(e, axis=-1, keepdims=True)
    probs_ref[...] = (e / denom).astype(probs_ref.dtype)


def prepare_params(params, compute_dtype=jnp.bfloat16):
    """One-time (init-time) param prep: pad hidden dims to 128-lane multiples
    and cast weights to the MXU operand dtype.  state_dim and action_dim stay
    unpadded.  Weights are [in, out] (transpose of nn.Linear); biases [1, out]
    stay f32 for the f32 epilogue.  Padded weight/bias lanes are zero, so the
    padded hidden units are exactly 0 after ReLU and contribute nothing."""
    w1, b1 = params["w1"], params["b1"]
    w2, b2 = params["w2"], params["b2"]
    w3, b3 = params["w3"], params["b3"]
    S, H1 = w1.shape
    H2, A = w2.shape[1], w3.shape[1]
    H1p, H2p = _round_up(H1, 128), _round_up(H2, 128)

    pad2 = lambda a, r, c: jnp.pad(a, ((0, r - a.shape[0]),
                                       (0, c - a.shape[1])))
    return {
        "w1": pad2(w1, S, H1p).astype(compute_dtype),
        "b1": pad2(b1, 1, H1p).astype(jnp.float32),
        "w2": pad2(w2, H1p, H2p).astype(compute_dtype),
        "b2": pad2(b2, 1, H2p).astype(jnp.float32),
        "w3": pad2(w3, H2p, A).astype(compute_dtype),
        "b3": b3.astype(jnp.float32),
    }


def actor_sac_forward(x, prepped, *, batch_tile: int = 512):
    """x: [B, state_dim] (f32 or bf16 — pass bf16 to halve input DMA bytes).
    prepped: output of prepare_params().  Returns probs [B, action_dim] f32."""
    w1, b1 = prepped["w1"], prepped["b1"]
    w2, b2 = prepped["w2"], prepped["b2"]
    w3, b3 = prepped["w3"], prepped["b3"]

    B, S = x.shape
    assert w1.shape[0] == S, "state_dim mismatch"
    A = w3.shape[1]

    tb = _choose_batch_tile(B, batch_tile)
    Bp = _round_up(B, tb)
    xp = x if Bp == B else jnp.pad(x, ((0, Bp - B), (0, 0)))

    # Constant index_map -> small weights/biases DMA'd once and VMEM-resident
    # across the whole batch grid; only x / probs tiles stream.
    resident = lambda a: pl.BlockSpec(a.shape, lambda i: (0, 0))

    probs = pl.pallas_call(
        actor_sac_kernel,
        out_shape=jax.ShapeDtypeStruct((Bp, A), jnp.float32),
        grid_spec=pltpu.PrefetchScalarGridSpec(
            num_scalar_prefetch=0,
            grid=(Bp // tb,),
            in_specs=[pl.BlockSpec((tb, S), lambda i: (i, 0)),
                      resident(w1), resident(b1),
                      resident(w2), resident(b2),
                      resident(w3), resident(b3)],
            out_specs=pl.BlockSpec((tb, A), lambda i: (i, 0)),
        ),
        compiler_params=pltpu.CompilerParams(
            dimension_semantics=("parallel",)),
    )(xp, w1, b1, w2, b2, w3, b3)

    return probs if Bp == B else probs[:B]


def init_params(key, state_dim, hidden_sizes, action_dim):
    """Deterministic init mimicking nn.Linear default (uniform +-1/sqrt(fan_in)).
    Weights stored as [in, out]; biases as [1, out]."""
    dims = [state_dim] + list(hidden_sizes) + [action_dim]
    params = {}
    for i, (din, dout) in enumerate(zip(dims[:-1], dims[1:])):
        key, kw, kb = jax.random.split(key, 3)
        bound = 1.0 / jnp.sqrt(jnp.float32(din))
        params[f"w{i + 1}"] = jax.random.uniform(
            kw, (din, dout), jnp.float32, minval=-bound, maxval=bound)
        params[f"b{i + 1}"] = jax.random.uniform(
            kb, (1, dout), jnp.float32, minval=-bound, maxval=bound)
    return params


def _reference_forward(x, params, compute_dtype=jnp.bfloat16):
    """Pure-JAX reference with the same operand dtypes / f32 accumulation."""
    h = x
    for i in (1, 2):
        h = jnp.dot(h.astype(compute_dtype),
                    params[f"w{i}"].astype(compute_dtype),
                    preferred_element_type=jnp.float32) + params[f"b{i}"]
        h = jnp.maximum(h, 0.0)
    logits = jnp.dot(h.astype(compute_dtype),
                     params["w3"].astype(compute_dtype),
                     preferred_element_type=jnp.float32) + params["b3"]
    return jax.nn.softmax(logits, axis=-1)


if __name__ == "__main__":
    # Small shapes consistent with the module: MLP actor head.
    batch = 8
    state_dim = 32
    hidden_sizes = (64, 64)
    action_dim = 16

    key = jax.random.PRNGKey(0)
    key, kx = jax.random.split(key)
    x = jax.random.normal(kx, (batch, state_dim), jnp.float32)
    params = init_params(key, state_dim, hidden_sizes, action_dim)
    prepped = prepare_params(params)          # one-time, outside the hot path

    probs = actor_sac_forward(x, prepped)
    probs = jax.block_until_ready(probs)

    # References: bf16-operand (kernel-matched) and full-f32 (sanity).
    ref_bf16 = _reference_forward(x, params, jnp.bfloat16)
    ref_f32 = _reference_forward(x, params, jnp.float32)

    assert probs.shape == (batch, action_dim)
    assert jnp.allclose(jnp.sum(probs, axis=-1), 1.0, atol=1e-3)
    assert jnp.allclose(probs, ref_bf16, atol=2e-3)
    assert jnp.allclose(probs, ref_f32, atol=2e-2)

    # Second config: batch-tail padding + multi-step parallel grid.
    key, kx2 = jax.random.split(key)
    x2 = jax.random.normal(kx2, (50, state_dim), jnp.float32)
    probs2 = jax.block_until_ready(
        actor_sac_forward(x2, prepped, batch_tile=24))
    assert probs2.shape == (50, action_dim)
    assert jnp.allclose(probs2, _reference_forward(x2, params, jnp.bfloat16),
                        atol=2e-3)

    print("KERNEL_OK")
</pallas_src>

<mosaic_0001>
module attributes {stable_mosaic.version = 11 : i64} {
  func.func @actor_sac_kernel(%arg0: i32, %arg1: memref<8x32xf32, #tpu.memory_space<vmem>>, %arg2: memref<32x128xbf16, #tpu.memory_space<vmem>>, %arg3: memref<1x128xf32, #tpu.memory_space<vmem>>, %arg4: memref<128x128xbf16, #tpu.memory_space<vmem>>, %arg5: memref<1x128xf32, #tpu.memory_space<vmem>>, %arg6: memref<128x16xbf16, #tpu.memory_space<vmem>>, %arg7: memref<1x16xf32, #tpu.memory_space<vmem>>, %arg8: memref<8x16xf32, #tpu.memory_space<vmem>>) attributes {dimension_semantics = [#tpu.dimension_semantics<parallel>], iteration_bounds = array<i64: 1>, scalar_prefetch = 0 : i64, scratch_operands = 0 : i64, tpu.core_type = #tpu.core_type<tc>, window_params = [{transform_indices = @transform_0, window_bounds = array<i64: 8, 32>}, {pipeline_mode = #tpu.pipeline_mode<synchronous>, transform_indices = @transform_1, window_bounds = array<i64: 32, 128>}, {pipeline_mode = #tpu.pipeline_mode<synchronous>, transform_indices = @transform_2, window_bounds = array<i64: 1, 128>}, {pipeline_mode = #tpu.pipeline_mode<synchronous>, transform_indices = @transform_3, window_bounds = array<i64: 128, 128>}, {pipeline_mode = #tpu.pipeline_mode<synchronous>, transform_indices = @transform_4, window_bounds = array<i64: 1, 128>}, {pipeline_mode = #tpu.pipeline_mode<synchronous>, transform_indices = @transform_5, window_bounds = array<i64: 128, 16>}, {pipeline_mode = #tpu.pipeline_mode<synchronous>, transform_indices = @transform_6, window_bounds = array<i64: 1, 16>}, {transform_indices = @transform_7, window_bounds = array<i64: 8, 16>}]} {
    %c0 = arith.constant 0 : index
    %c0_0 = arith.constant 0 : index
    %0 = vector.load %arg1[%c0, %c0_0] : memref<8x32xf32, #tpu.memory_space<vmem>>, vector<8x32xf32>
    %1 = arith.truncf %0 : vector<8x32xf32> to vector<8x32xbf16>
    %c0_1 = arith.constant 0 : index
    %c0_2 = arith.constant 0 : index
    %2 = vector.load %arg2[%c0_1, %c0_2] : memref<32x128xbf16, #tpu.memory_space<vmem>>, vector<32x128xbf16>
    %cst = arith.constant dense<0.000000e+00> : vector<8x128xf32>
    %3 = tpu.matmul %1, %2, %cst {dimension_numbers = #tpu.dot_dimension_numbers<[1], [0], [0], [1], [0, 0, 1, 1], [], []>} : vector<8x32xbf16>, vector<32x128xbf16>, vector<8x128xf32> -> vector<8x128xf32>
    %c0_3 = arith.constant 0 : index
    %c0_4 = arith.constant 0 : index
    %4 = vector.load %arg3[%c0_3, %c0_4] : memref<1x128xf32, #tpu.memory_space<vmem>>, vector<1x128xf32>
    %5 = vector.broadcast %4 : vector<1x128xf32> to vector<8x128xf32>
    %6 = arith.addf %3, %5 : vector<8x128xf32>
    %cst_5 = arith.constant 0.000000e+00 : f32
    %7 = vector.broadcast %cst_5 : f32 to vector<8x128xf32>
    %8 = arith.maximumf %6, %7 : vector<8x128xf32>
    %9 = arith.truncf %8 : vector<8x128xf32> to vector<8x128xbf16>
    %c0_6 = arith.constant 0 : index
    %c0_7 = arith.constant 0 : index
    %10 = vector.load %arg4[%c0_6, %c0_7] : memref<128x128xbf16, #tpu.memory_space<vmem>>, vector<128x128xbf16>
    %cst_8 = arith.constant dense<0.000000e+00> : vector<8x128xf32>
    %11 = tpu.matmul %9, %10, %cst_8 {dimension_numbers = #tpu.dot_dimension_numbers<[1], [0], [0], [1], [0, 0, 1, 1], [], []>} : vector<8x128xbf16>, vector<128x128xbf16>, vector<8x128xf32> -> vector<8x128xf32>
    %c0_9 = arith.constant 0 : index
    %c0_10 = arith.constant 0 : index
    %12 = vector.load %arg5[%c0_9, %c0_10] : memref<1x128xf32, #tpu.memory_space<vmem>>, vector<1x128xf32>
    %13 = vector.broadcast %12 : vector<1x128xf32> to vector<8x128xf32>
    %14 = arith.addf %11, %13 : vector<8x128xf32>
    %cst_11 = arith.constant 0.000000e+00 : f32
    %15 = vector.broadcast %cst_11 : f32 to vector<8x128xf32>
    %16 = arith.maximumf %14, %15 : vector<8x128xf32>
    %17 = arith.truncf %16 : vector<8x128xf32> to vector<8x128xbf16>
    %c0_12 = arith.constant 0 : index
    %c0_13 = arith.constant 0 : index
    %18 = vector.load %arg6[%c0_12, %c0_13] : memref<128x16xbf16, #tpu.memory_space<vmem>>, vector<128x16xbf16>
    %cst_14 = arith.constant dense<0.000000e+00> : vector<8x16xf32>
    %19 = tpu.matmul %17, %18, %cst_14 {dimension_numbers = #tpu.dot_dimension_numbers<[1], [0], [0], [1], [0, 0, 1, 1], [], []>} : vector<8x128xbf16>, vector<128x16xbf16>, vector<8x16xf32> -> vector<8x16xf32>
    %c0_15 = arith.constant 0 : index
    %c0_16 = arith.constant 0 : index
    %20 = vector.load %arg7[%c0_15, %c0_16] : memref<1x16xf32, #tpu.memory_space<vmem>>, vector<1x16xf32>
    %21 = vector.broadcast %20 : vector<1x16xf32> to vector<8x16xf32>
    %22 = arith.addf %19, %21 : vector<8x16xf32>
    %cst_17 = arith.constant dense<0xFF800000> : vector<8xf32>
    %23 = vector.multi_reduction <maximumf>, %22, %cst_17 [1] : vector<8x16xf32> to vector<8xf32>
    %24 = vector.shape_cast %23 : vector<8xf32> to vector<8x1xf32>
    %25 = vector.broadcast %24 : vector<8x1xf32> to vector<8x16xf32>
    %26 = arith.subf %22, %25 : vector<8x16xf32>
    %27 = math.exp %26 : vector<8x16xf32>
    %cst_18 = arith.constant dense<0.000000e+00> : vector<8xf32>
    %28 = vector.multi_reduction <add>, %27, %cst_18 [1] : vector<8x16xf32> to vector<8xf32>
    %29 = vector.shape_cast %28 : vector<8xf32> to vector<8x1xf32>
    %30 = vector.broadcast %29 : vector<8x1xf32> to vector<8x16xf32>
    %31 = arith.divf %27, %30 : vector<8x16xf32>
    %c0_19 = arith.constant 0 : index
    %c0_20 = arith.constant 0 : index
    %32 = vector.load %arg8[%c0_19, %c0_20] : memref<8x16xf32, #tpu.memory_space<vmem>>, vector<8x16xf32>
    tpu.vector_store %arg8[%c0_19, %c0_20], %31 {strides = array<i32>} : memref<8x16xf32, #tpu.memory_space<vmem>>, vector<8x16xf32>,
    return
  }
  func.func @transform_0(%arg0: i32) -> (i32, i32) {
    %c0_i32 = arith.constant 0 : i32
    %c0_i32_0 = arith.constant 0 : i32
    return %arg0, %c0_i32 : i32, i32
  }
  func.func @transform_1(%arg0: i32) -> (i32, i32) {
    %c0_i32 = arith.constant 0 : i32
    %c0_i32_0 = arith.constant 0 : i32
    %c0_i32_1 = arith.constant 0 : i32
    return %c0_i32, %c0_i32_0 : i32, i32
  }
  func.func @transform_2(%arg0: i32) -> (i32, i32) {
    %c0_i32 = arith.constant 0 : i32
    %c0_i32_0 = arith.constant 0 : i32
    %c0_i32_1 = arith.constant 0 : i32
    return %c0_i32, %c0_i32_0 : i32, i32
  }
  func.func @transform_3(%arg0: i32) -> (i32, i32) {
    %c0_i32 = arith.constant 0 : i32
    %c0_i32_0 = arith.constant 0 : i32
    %c0_i32_1 = arith.constant 0 : i32
    return %c0_i32, %c0_i32_0 : i32, i32
  }
  func.func @transform_4(%arg0: i32) -> (i32, i32) {
    %c0_i32 = arith.constant 0 : i32
    %c0_i32_0 = arith.constant 0 : i32
    %c0_i32_1 = arith.constant 0 : i32
    return %c0_i32, %c0_i32_0 : i32, i32
  }
  func.func @transform_5(%arg0: i32) -> (i32, i32) {
    %c0_i32 = arith.constant 0 : i32
    %c0_i32_0 = arith.constant 0 : i32
    %c0_i32_1 = arith.constant 0 : i32
    return %c0_i32, %c0_i32_0 : i32, i32
  }
  func.func @transform_6(%arg0: i32) -> (i32, i32) {
    %c0_i32 = arith.constant 0 : i32
    %c0_i32_0 = arith.constant 0 : i32
    %c0_i32_1 = arith.constant 0 : i32
    return %c0_i32, %c0_i32_0 : i32, i32
  }
  func.func @transform_7(%arg0: i32) -> (i32, i32) {
    %c0_i32 = arith.constant 0 : i32
    %c0_i32_0 = arith.constant 0 : i32
    return %arg0, %c0_i32 : i32, i32
  }
}

</mosaic_0001>

<bundles_post_ra>
// kernel: tpu_custom_call.1
= control target key start
LH: loop header
LB: loop body
LE: loop exit
PB: predicated region body
PF: predicated region fallthrough
CT: control target
= control target key end

     0   :  { %12 = vsyncpa [#allocation3], 0  ;;  %s559_s0 = inlined_call_operand.vmem [shape: f32[8,32], index: 0, kind: input, shape index: {}]   ;;  %s560_s1 = inlined_call_operand.hbm [shape: bf16[32,128], index: 1, kind: input, shape index: {}]   ;;  %s561_s2 = inlined_call_operand.vmem [shape: f32[1,128], index: 2, kind: input, shape index: {}]   ;;  %s562_s3 = inlined_call_operand.vmem [shape: bf16[128,128], index: 3, kind: input, shape index: {}]   ;;  %s563_s4 = inlined_call_operand.vmem [shape: f32[1,128], index: 4, kind: input, shape index: {}]   ;;  %s564_s5 = inlined_call_operand.vmem [shape: bf16[128,16], index: 5, kind: input, shape index: {}]   ;;  %s565_s6 = inlined_call_operand.vmem [shape: f32[1,16], index: 6, kind: input, shape index: {}]   ;;  %s566_s7 = inlined_call_operand.hbm [shape: f32[8,16], index: 7, kind: output, shape index: {}]  }
   0x1   :  { %13 = vsyncpa [#allocation4], 0  ;;  %s20_s26 = sshll.u32 %s560_s1, 4  ;;  %s446_s27 = smov [#allocation2]   ;;  %s21_s26 = int_to_ptr.hbm [resolvable:$true] %s20_s26 }
   0x2   :  { %s22_s28 = sshll.u32 %s446_s27, 4  ;;  %s447_s29 = smov 64   ;;  %s23_s28 = int_to_ptr.vmem [resolvable:$true] %s22_s28 }
   0x3   :  { %s448_s30 = smov 4  }
   0x4   :  { %28 = dma.hbm_to_vmem [thread:$0]  %s21_s26, 256, %s23_s28, [#allocation3], %s447_s29, %s447_s29, %s448_s30  }
   0x5   :  { %442 = dma.done.wait [#allocation3], 256  }
   0x6   :  { %443 = vsyncadd [#allocation3], 4294967040  ;;  %v366_v0 = vld [vmem:[#allocation2 + $0x8] sm:$0xff]  ;;  %v374_v1 = vld [vmem:[%s562_s3 + $0x38] sm:$0xff]  ;;  %vm66_vm0 = vcmask 261120   ;;  %vm249_vm1 = vcmask 130048  }
   0x7   :  { %76 = vmatpush.bf16.msra.mxu0 %v366_v0  ;;  %v365_v2 = vld [vmem:[#allocation2] sm:$0xff]  ;;  %153 = vmatpush.bf16.msra.mxu1 %v374_v1  ;;  %v373_v4 = vld [vmem:[%s562_s3 + $0x30] sm:$0xff]  ;;  %v372_v6 = vld [vmem:[%s562_s3 + $0x28] sm:$0xff]  ;;  %s282_s20 = sshll.u32 %s566_s7, 4  ;;  %s283_s20 = int_to_ptr.hbm [resolvable:$true] %s282_s20 }
   0x8   :  { %v44_v3 = vld [vmem:[%s559_s0] sm:$0xff]  ;;  %v370_v8 = vld [vmem:[%s562_s3 + $0x18] sm:$0xff]  ;;  %v369_v9 = vld [vmem:[%s562_s3 + $0x10] sm:$0xff] }
   0x9   :  { %v45_v5 = vpack.c.bf16 %v44_v3, %v44_v3  ;;  %v371_v7 = vld [vmem:[%s562_s3 + $0x20] sm:$0xff]  ;;  %v368_v10 = vld [vmem:[%s562_s3 + $0x8] sm:$0xff]  ;;  %v382_v12 = vld [vmem:[%s564_s5 + $0x38] sm:$0xff] }
   0xa   :  { %v367_v11 = vld [vmem:[%s562_s3] sm:$0xff]  ;;  %236 = vmatpush.bf16.msra.mxu2 %v382_v12  ;;  %v381_v13 = vld [vmem:[%s564_s5 + $0x30] sm:$0xff]  ;;  %v380_v14 = vld [vmem:[%s564_s5 + $0x28] sm:$0xff] }
   0xb   :  { %77 = vmatpush.bf16.msra.mxu0 %v365_v2  ;;  %154 = vmatpush.bf16.msra.mxu1 %v373_v4  ;;  %v379_v15 = vld [vmem:[%s564_s5 + $0x20] sm:$0xff]  ;;  %v378_v16 = vld [vmem:[%s564_s5 + $0x18] sm:$0xff]  ;;  %v377_v17 = vld [vmem:[%s564_s5 + $0x10] sm:$0xff] }
   0xc   :  { %v387_v18 = vld [vmem:[%s561_s2] ss:$0 sm:$0xff]  ;;  %v376_v24 = vld [vmem:[%s564_s5 + $0x8] sm:$0xff] }
   0xd   :  { %v375_v25 = vld [vmem:[%s564_s5] sm:$0xff] }
   0xe   :  { %300 = vmatmul.msk.bf16.vlgmr.msra.gmra.mxu0 %vm66_vm0, %v45_v5  ;;  %237 = vmatpush.bf16.msra.mxu2 %v381_v13  ;;  %v388_v26 = vld [vmem:[%s563_s4] ss:$0 sm:$0xff]  ;;  %s449_s4 = smov [#allocation5]  }
   0xf   :  { %155 = vmatpush.bf16.msra.mxu1 %v372_v6  ;;  %v389_v32 = vld [vmem:[%s565_s6] ss:$0 sm:$0xff]  ;;  %s280_s5 = sshll.u32 %s449_s4, 4  ;;  %s281_s5 = int_to_ptr.vmem [resolvable:$true] %s280_s5 }
  0x12   :  { %238 = vmatpush.bf16.msra.mxu2 %v380_v14 }
  0x13   :  { %156 = vmatpush.bf16.msra.mxu1 %v371_v7 }
  0x16   :  { %239 = vmatpush.bf16.msra.mxu2 %v379_v15 }
  0x17   :  { %157 = vmatpush.bf16.msra.mxu1 %v370_v8 }
  0x1a   :  { %240 = vmatpush.bf16.msra.mxu2 %v378_v16 }
  0x1b   :  { %158 = vmatpush.bf16.msra.mxu1 %v369_v9 }
  0x1e   :  { %241 = vmatpush.bf16.msra.mxu2 %v377_v17 }
  0x1f   :  { %159 = vmatpush.bf16.msra.mxu1 %v368_v10 }
  0x22   :  { %242 = vmatpush.bf16.msra.mxu2 %v376_v24 }
  0x23   :  { %160 = vmatpush.bf16.msra.mxu1 %v367_v11 }
  0x26   :  { %243 = vmatpush.bf16.msra.mxu2 %v375_v25 }
  0x8b   :  { %v79_v19 = vpop.f32.mrf.mxu0 }
  0x8c   :  { %v80_v20 = vadd.f32 %v387_v18, %v79_v19 }
  0x8e   :  { %v83_v21 = vmax.f32 %v80_v20, 0.0 }
  0x90   :  { %v84_v22 = vpack.c.bf16 %v83_v21, %v83_v21 }
  0x92   :  { %161 = vmatmul.bf16.vlgmr.msra.gmra.mxu1 %v84_v22 }
  0x93   :  { %v81_v23 = vpop.f32.mrf.mxu0 }
 0x10f   :  { %v162_v27 = vpop.f32.mrf.mxu1 }
 0x110   :  { %v163_v28 = vadd.f32 %v388_v26, %v162_v27 }
 0x112   :  { %v166_v29 = vmax.f32 %v163_v28, 0.0 }
 0x114   :  { %v167_v30 = vpack.c.bf16 %v166_v29, %v166_v29 }
 0x116   :  { %244 = vmatmul.bf16.vlgmr.msra.gmra.mxu2 %v167_v30 }
 0x117   :  { %v164_v31 = vpop.f32.mrf.mxu1 }
 0x199   :  { %v245_v33 = vpop.f32.mrf.mxu2 }
 0x19a   :  { %v246_v34 = vadd.f32 %v389_v32, %v245_v33 }
 0x19c   :  { %v250_v35 = vsel %vm249_vm1, %v246_v34, -inf }
 0x19d   :  { %251 = vmax.xlane.f32.xlu0 %v250_v35 }
 0x1a1   :  { %v247_v36 = vpop.f32.mrf.mxu2 }
 0x210   :  { %v252_v37 = vpop.xlane.xlu0 %251 }
 0x211   :  { %v253_v38 = vsub.f32 %v246_v34, %v252_v37 }
 0x213   :  { %v254_v39 = vmul.f32 1.442695, %v253_v38 }
 0x215   :  { %390 = vpow2.f32 %v254_v39 }
 0x21b   :  { %v391_v40 = vpop.eup %390 }
 0x21c   :  { %v256_v41 = vsel %vm249_vm1, %v391_v40, 0.0 }
 0x21d   :  { %257 = vadd.xlane.f32.xlu0 %v256_v41 }
 0x290   :  { %v258_v42 = vpop.xlane.xlu0 %257 }
 0x291   :  { %392 = vrcp.f32 %v258_v42  ;;  %v270_v46 = vand.u32 2147483648, %v258_v42  ;;  %v268_v48 = vand.u32 2147483647, %v258_v42  ;;  %vm264_vm3 = vweird.f32 %v258_v42 }
 0x293   :  { %v271_v50 = vor.u32 1.1754944e-38, %v270_v46  ;;  %vm269_vm5 = vcmp.eq.f32.partialorder %v268_v48, 8.507059e+37 }
 0x297   :  { %v393_v43 = vpop.eup %392 }
 0x298   :  { %v260_v44 = vmul.f32 %v393_v43, %v258_v42  ;;  %vm265_vm2 = vweird.f32 %v393_v43 }
 0x299   :  { %vm266_vm4 = vmor %vm264_vm3, %vm265_vm2 }
 0x29a   :  { %v261_v45 = vsub.f32 1.0, %v260_v44 }
 0x29c   :  { %v262_v47 = vmul.f32 %v393_v43, %v261_v45 }
 0x29e   :  { %v263_v49 = vadd.f32 %v393_v43, %v262_v47 }
 0x2a0   :  { %v267_v51 = vsel %vm266_vm4, %v393_v43, %v263_v49 }
 0x2a1   :  { %v272_v52 = vsel %vm269_vm5, %v271_v50, %v267_v51 }
 0x2a2   :  { %v273_v53 = vmul.f32 %v391_v40, %v272_v52 }
 0x2a4   :  { %274 = vst.msk [vmem:[#allocation5] sm:$0xff] %vm249_vm1, %v273_v53 }
 0x2a5   :  { %285 = dma.vmem_to_hbm [thread:$0]  %s281_s5, 128, %s283_s20, [#allocation4]  }
 0x2a6   :  { %444 = dma.done.wait [#allocation4], 128  }
 0x2a7   :  { %445 = vsyncadd [#allocation4], 4294967168 }
 0x2a8   :  { %290 = vsyncpa [#allocation3], 1 }
 0x2a9   :  { %291 = vsyncpa [#allocation4], 1 }

</bundles_post_ra>
